<compile_context>
chip_gen: v7x
topology: tpu7x:2x2x1
jax: 0.10.0
libtpu: 0.0.40
codegen_flags: <defaults>
</compile_context>

<pallas_src>
import math
from functools import partial

import numpy as np
import jax
import jax.numpy as jnp
from jax.experimental import pallas as pl
from jax.experimental.pallas import tpu as pltpu


# ----------------------------------------------------------------------------
# helpers
# ----------------------------------------------------------------------------
def _pick_tile(dim, candidates):
    """Largest candidate tile that evenly divides `dim`; else the full dim."""
    for t in candidates:
        if t <= dim and dim % t == 0:
            return t
    return dim


def _vmem_capacity_bytes():
    # Per-chip VMEM (64 MiB on v7x, 128 MiB on v5e/v6e); conservative fallback.
    try:
        return int(pltpu.get_tpu_info().vmem_capacity_bytes)
    except Exception:
        return 64 << 20


def _vmem_limit_bytes(working_bytes):
    """Explicit scoped-VMEM limit: working set + headroom, clamped per chip."""
    est = int(1.5 * working_bytes) + (8 << 20)
    cap = int(0.9 * _vmem_capacity_bytes())
    return max(min(est, cap), 32 << 20)


# ----------------------------------------------------------------------------
# Tiled linear:  o = x @ w + b   (grid over M/N tiles, K accumulated in VMEM)
# ----------------------------------------------------------------------------
def _linear_kernel(x_ref, w_ref, b_ref, o_ref, acc_ref):
    k = pl.program_id(2)

    @pl.when(k == 0)
    def _():
        acc_ref[...] = jnp.zeros_like(acc_ref)

    # bf16 MXU operands, f32 accumulation.
    acc_ref[...] += jnp.dot(x_ref[...].astype(jnp.bfloat16),
                            w_ref[...].astype(jnp.bfloat16),
                            preferred_element_type=jnp.float32)

    @pl.when(k == pl.num_programs(2) - 1)
    def _():
        o_ref[...] = (acc_ref[...] +
                      b_ref[...].astype(jnp.float32)).astype(o_ref.dtype)


def linear(x, w, b, out_dtype=None):
    """x: (M, K), w: (K, N), b: (1, N) -> (M, N) in out_dtype (default x.dtype)."""
    M, K = x.shape
    N = w.shape[1]
    out_dtype = jnp.dtype(out_dtype) if out_dtype is not None else x.dtype
    # Larger tiles (per review): mem-bound matmuls get closer to HBM roofline.
    tm = _pick_tile(M, (1024, 512, 256, 128, 64, 32, 16, 8))
    tn = _pick_tile(N, (512, 256, 128))
    tk = _pick_tile(K, (512, 256, 128))
    grid = (M // tm, N // tn, K // tk)
    working = (2 * (tm * tk * x.dtype.itemsize
                    + tk * tn * w.dtype.itemsize
                    + tm * tn * out_dtype.itemsize)
               + tm * tn * 4 + tn * 4)
    return pl.pallas_call(
        _linear_kernel,
        out_shape=jax.ShapeDtypeStruct((M, N), out_dtype),
        grid_spec=pltpu.PrefetchScalarGridSpec(
            num_scalar_prefetch=0,
            grid=grid,
            in_specs=[
                pl.BlockSpec((tm, tk), lambda i, j, k: (i, k)),
                pl.BlockSpec((tk, tn), lambda i, j, k: (k, j)),
                pl.BlockSpec((1, tn), lambda i, j, k: (0, j)),
            ],
            out_specs=pl.BlockSpec((tm, tn), lambda i, j, k: (i, j)),
            scratch_shapes=[pltpu.VMEM((tm, tn), jnp.float32)],
        ),
        compiler_params=pltpu.CompilerParams(
            dimension_semantics=("parallel", "parallel", "arbitrary"),
            vmem_limit_bytes=_vmem_limit_bytes(working)),
    )(x, w, b)


# ----------------------------------------------------------------------------
# Relative attention core: flash-style online softmax over Lk tiles,
# Shaw "skew" formulation (only the tiny (2c+1, hd) tables enter VMEM).
# ----------------------------------------------------------------------------
def _dot_nt(a, b):
    """a @ b.T on the MXU with f32 accumulation (no explicit transpose)."""
    return jax.lax.dot_general(a, b, (((1,), (1,)), ((), ())),
                               preferred_element_type=jnp.float32)


def _rel_attn_kernel(q_ref, k_ref, v_ref, ek_ref, ev_ref, o_ref,
                     m_sc, l_sc, acc_sc, *, num_heads, head_dim, clip):
    tq = q_ref.shape[0]
    tk = k_ref.shape[0]
    n_buckets = 2 * clip + 1
    s = pl.program_id(2)

    @pl.when(s == 0)
    def _():
        m_sc[...] = jnp.full_like(m_sc, -jnp.inf)
        l_sc[...] = jnp.zeros_like(l_sc)
        acc_sc[...] = jnp.zeros_like(acc_sc)

    # Clipped relative-distance bucket masks for this (q-tile, kv-tile) pair.
    # Hoisted: computed ONCE per grid step and reused by every head.
    q_off = pl.program_id(1) * tq
    k_off = s * tk
    q_pos = jax.lax.broadcasted_iota(jnp.int32, (tq, tk), 0) + q_off
    k_pos = jax.lax.broadcasted_iota(jnp.int32, (tq, tk), 1) + k_off
    ids = jnp.clip(k_pos - q_pos, -clip, clip) + clip                # (tq, tk)
    masks = [ids == r for r in range(n_buckets)]
    # TODO(synk): for large clipping_threshold the unrolled R loops below grow
    # code size linearly; a log-depth segmented formulation would be needed.

    ek = ek_ref[...]                           # (R, hd) bf16 (MXU operand)
    ev = ev_ref[...].astype(jnp.float32)       # (R, hd) f32 (VPU FMA operand)

    # TODO(synk): for very large num_heads switch to lax.fori_loop with
    # pl.ds(h*hd, hd) lane offsets to bound live ranges / code size.
    for h in range(num_heads):
        sl = slice(h * head_dim, (h + 1) * head_dim)
        qh = q_ref[:, sl]                      # (tq, hd) bf16 (pre-scaled by 1/sqrt(hd))
        kh = k_ref[:, sl]                      # (tk, hd) bf16
        vh = v_ref[:, sl]                      # (tk, hd) bf16

        # content-content + content-position logits (both MXU, f32 acc)
        logits = _dot_nt(qh, kh)               # (tq, tk)
        qe = _dot_nt(qh, ek)                   # (tq, R)
        for r in range(n_buckets):             # skew gather via hoisted masks
            logits = logits + jnp.where(masks[r], qe[:, r:r + 1], 0.0)

        # flash-style online softmax across kv tiles
        m_prev = m_sc[h]                                           # (tq, 1)
        m_new = jnp.maximum(m_prev, jnp.max(logits, axis=-1, keepdims=True))
        alpha = jnp.exp(m_prev - m_new)
        p = jnp.exp(logits - m_new)                                # (tq, tk) f32
        l_sc[h] = alpha * l_sc[h] + jnp.sum(p, axis=-1, keepdims=True)
        m_sc[h] = m_new

        # content-value term (MXU, K = tk, bf16 operands) ...
        pv = jnp.dot(p.astype(jnp.bfloat16), vh,
                     preferred_element_type=jnp.float32)           # (tq, hd)
        # ... + position-value term: R broadcast FMAs instead of a tiny-K matmul
        for r in range(n_buckets):
            bsum = jnp.sum(jnp.where(masks[r], p, 0.0), axis=-1, keepdims=True)
            pv = pv + bsum * ev[r:r + 1, :]

        acc_sc[:, sl] = alpha * acc_sc[:, sl] + pv

    @pl.when(s == pl.num_programs(2) - 1)
    def _():
        # per-head normalisation in scratch, then ONE lane-dense (tq, E) store
        for h in range(num_heads):
            sl = slice(h * head_dim, (h + 1) * head_dim)
            inv_l = pl.reciprocal(l_sc[h], approx=True)    # EUP slot, ~free
            acc_sc[:, sl] = acc_sc[:, sl] * inv_l
        o_ref[...] = acc_sc[...].astype(o_ref.dtype)
        # TODO(synk): nn.Dropout on attention weights skipped (eval-mode identity).


def relative_attention_core(q, k, v, emb_k, emb_v, num_heads, clip, *,
                            tq=None, tk=None):
    """q: (B, Lq, E), k/v: (B, Lk, E), emb_*: (2c+1, hd) -> (B, Lq, E) bf16."""
    B, Lq, E = q.shape
    Lk = k.shape[1]
    assert E % num_heads == 0, "embed_dim must be divisible by num_heads"
    hd = E // num_heads
    n_buckets = 2 * clip + 1

    # bf16 MXU operands (projections already emit bf16; casts then are no-ops)
    q = q.astype(jnp.bfloat16)
    k = k.astype(jnp.bfloat16)
    v = v.astype(jnp.bfloat16)
    emb_k = emb_k.astype(jnp.bfloat16)
    emb_v = emb_v.astype(jnp.bfloat16)

    if tk is None:
        tk = _pick_tile(Lk, (512, 256, 128, 64, 32, 16, 8))
    if tq is None:
        # bound the live (tq, tk) f32 intermediates per head (re-derive per chip;
        # effectively halves usable tq on v7x's 64 MiB VMEM)
        budget = 128 * 1024
        tq = next((t for t in (512, 256, 128, 64, 32, 16, 8)
                   if t <= Lq and Lq % t == 0 and t * tk <= budget),
                  _pick_tile(Lq, (512, 256, 128, 64, 32, 16, 8)))
    assert Lq % tq == 0 and Lk % tk == 0

    kernel = partial(_rel_attn_kernel, num_heads=num_heads, head_dim=hd,
                     clip=clip)

    working = (2 * (tq * E * 2 + 2 * tk * E * 2 + tq * E * 2      # q/k/v/out blocks (double-buffered)
                    + 2 * n_buckets * hd * 2)
               + tq * E * 4 + 2 * num_heads * tq * 128 * 4        # acc + (lane-padded) m/l scratch
               + 8 * tq * tk * 4)                                 # live per-head f32 intermediates

    # Megacore: B * (Lq // tq) parallel steps are sharded across TensorCores.
    grid = (B, Lq // tq, Lk // tk)
    return pl.pallas_call(
        kernel,
        out_shape=jax.ShapeDtypeStruct((B, Lq, E), jnp.bfloat16),
        grid_spec=pltpu.PrefetchScalarGridSpec(
            num_scalar_prefetch=0,
            grid=grid,
            in_specs=[
                pl.BlockSpec((pl.Squeezed(), tq, E), lambda b, t, s: (b, t, 0)),
                pl.BlockSpec((pl.Squeezed(), tk, E), lambda b, t, s: (b, s, 0)),
                pl.BlockSpec((pl.Squeezed(), tk, E), lambda b, t, s: (b, s, 0)),
                pl.BlockSpec((n_buckets, hd), lambda b, t, s: (0, 0)),
                pl.BlockSpec((n_buckets, hd), lambda b, t, s: (0, 0)),
            ],
            out_specs=pl.BlockSpec((pl.Squeezed(), tq, E),
                                   lambda b, t, s: (b, t, 0)),
            scratch_shapes=[
                pltpu.VMEM((num_heads, tq, 1), jnp.float32),   # running max m
                pltpu.VMEM((num_heads, tq, 1), jnp.float32),   # running denom l
                pltpu.VMEM((tq, E), jnp.float32),              # running numerator
            ],
        ),
        compiler_params=pltpu.CompilerParams(
            dimension_semantics=("parallel", "parallel", "arbitrary"),
            vmem_limit_bytes=_vmem_limit_bytes(working)),
    )(q, k, v, emb_k, emb_v)


# ----------------------------------------------------------------------------
# Parameter prep (one-time host transform) + module forward
# ----------------------------------------------------------------------------
def prepare_params(params, num_heads):
    """Fold 1/sqrt(head_dim) into wq/bq, build fused QKV weights, bf16 tables."""
    E = params["wq"].shape[0]
    hd = E // num_heads
    inv_scale = 1.0 / math.sqrt(hd)
    p = dict(params)
    p["wq"] = params["wq"] * inv_scale
    p["bq"] = params["bq"] * inv_scale
    p["w_qkv"] = jnp.concatenate([p["wq"], params["wk"], params["wv"]], axis=1)
    p["b_qkv"] = jnp.concatenate([p["bq"], params["bk"], params["bv"]], axis=1)
    p["emb_k"] = params["emb_k"].astype(jnp.bfloat16)
    p["emb_v"] = params["emb_v"].astype(jnp.bfloat16)
    return p


def relative_mha_forward(query, key, value, params, num_heads,
                         clipping_threshold, *, tq=None, tk=None):
    """params must come from prepare_params(). Returns (B, Lq, E)."""
    B, Lq, E = query.shape
    Lk = key.shape[1]
    if query is key and key is value:
        # Self-attention: fused (E, 3E) projection -> read activations once.
        qkv = linear(query.reshape(B * Lq, E), params["w_qkv"], params["b_qkv"],
                     out_dtype=jnp.bfloat16)
        q = qkv[:, :E].reshape(B, Lq, E)
        k = qkv[:, E:2 * E].reshape(B, Lq, E)
        v = qkv[:, 2 * E:].reshape(B, Lq, E)
    else:
        q = linear(query.reshape(B * Lq, E), params["wq"], params["bq"],
                   out_dtype=jnp.bfloat16).reshape(B, Lq, E)
        k = linear(key.reshape(B * Lk, E), params["wk"], params["bk"],
                   out_dtype=jnp.bfloat16).reshape(B, Lk, E)
        v = linear(value.reshape(B * Lk, E), params["wv"], params["bv"],
                   out_dtype=jnp.bfloat16).reshape(B, Lk, E)

    ctx = relative_attention_core(q, k, v, params["emb_k"], params["emb_v"],
                                  num_heads, clipping_threshold, tq=tq, tk=tk)

    out = linear(ctx.reshape(B * Lq, E), params["wo"], params["bo"],
                 out_dtype=query.dtype)
    return out.reshape(B, Lq, E)
    # TODO(synk): optional boolean `mask` and need_weights outputs not implemented.


# ----------------------------------------------------------------------------
# Pure-JAX reference (mirrors the PyTorch forward exactly, f32 throughout)
# ----------------------------------------------------------------------------
def relative_position_table(emb_table, length_q, length_k, clipping_threshold):
    rq = jnp.arange(length_q)
    rk = jnp.arange(length_k)
    dist = rk[None, :] - rq[:, None]
    idx = jnp.clip(dist, -clipping_threshold, clipping_threshold) + clipping_threshold
    return emb_table[idx]


def reference_forward(query, key, value, params, num_heads, clipping_threshold):
    B, Lq, E = query.shape
    Lk = key.shape[1]
    hd = E // num_heads
    q = query @ params["wq"] + params["bq"]
    k = key @ params["wk"] + params["bk"]
    v = value @ params["wv"] + params["bv"]
    rel_k = relative_position_table(params["emb_k"], Lq, Lk, clipping_threshold)
    rel_v = relative_position_table(params["emb_v"], Lq, Lk, clipping_threshold)
    qh = q.reshape(B, Lq, num_heads, hd).transpose(0, 2, 1, 3)
    kh = k.reshape(B, Lk, num_heads, hd).transpose(0, 2, 1, 3)
    vh = v.reshape(B, Lk, num_heads, hd).transpose(0, 2, 1, 3)
    attn1 = jnp.einsum("bhqd,bhkd->bhqk", qh, kh)
    attn2 = jnp.einsum("bhqd,qkd->bhqk", qh, rel_k)
    logits = (attn1 + attn2) / jnp.sqrt(jnp.float32(hd))
    w = jax.nn.softmax(logits, axis=-1)
    avg1 = jnp.einsum("bhqk,bhkd->bhqd", w, vh)
    avg2 = jnp.einsum("bhqk,qkd->bhqd", w, rel_v)
    x = (avg1 + avg2).transpose(0, 2, 1, 3).reshape(B, Lq, E)
    return x @ params["wo"] + params["bo"]


# ----------------------------------------------------------------------------
if __name__ == "__main__":
    # small, module-consistent shapes
    B, L, E, H = 2, 8, 32, 4
    hd = E // H
    clipping_threshold = 4
    num_embeddings = 2 * clipping_threshold + 1

    root = jax.random.PRNGKey(0)
    keys = jax.random.split(root, 16)

    def w(k_, shape, s=0.1):
        return s * jax.random.normal(k_, shape, jnp.float32)

    params = {
        "wq": w(keys[3], (E, E)), "bq": w(keys[4], (1, E), 0.01),
        "wk": w(keys[5], (E, E)), "bk": w(keys[6], (1, E), 0.01),
        "wv": w(keys[7], (E, E)), "bv": w(keys[8], (1, E), 0.01),
        "wo": w(keys[9], (E, E)), "bo": w(keys[10], (1, E), 0.01),
        "emb_k": w(keys[11], (num_embeddings, hd)),
        "emb_v": w(keys[12], (num_embeddings, hd)),
    }
    prepared = prepare_params(params, H)
    # TODO(synk): pos_encoding == "relative_3D" (PDB contact maps via networkx)
    # has no in-kernel equivalent; only the "relative" path is implemented.

    # --- case 1: self-attention -> fused (E, 3E) QKV projection path --------
    x = jax.random.normal(keys[0], (B, L, E), jnp.float32)
    out1 = jax.block_until_ready(
        relative_mha_forward(x, x, x, prepared, H, clipping_threshold))
    ref1 = reference_forward(x, x, x, params, H, clipping_threshold)
    np.testing.assert_allclose(np.asarray(out1), np.asarray(ref1),
                               rtol=2e-2, atol=2e-2)   # bf16 MXU tolerance

    # --- case 2: cross-attention, Lq != Lk, forced small tiles so the -------
    # --- flash-style kv accumulation spans multiple grid steps --------------
    Lq2, Lk2 = 16, 24
    q2 = jax.random.normal(keys[1], (B, Lq2, E), jnp.float32)
    k2 = jax.random.normal(keys[2], (B, Lk2, E), jnp.float32)
    v2 = jax.random.normal(keys[13], (B, Lk2, E), jnp.float32)
    out2 = jax.block_until_ready(
        relative_mha_forward(q2, k2, v2, prepared, H, clipping_threshold,
                             tq=8, tk=8))
    ref2 = reference_forward(q2, k2, v2, params, H, clipping_threshold)
    np.testing.assert_allclose(np.asarray(out2), np.asarray(ref2),
                               rtol=2e-2, atol=2e-2)

    print("KERNEL_OK")
</pallas_src>

<mosaic_0001>
module attributes {stable_mosaic.version = 11 : i64} {
  func.func @_linear_kernel(%arg0: i32, %arg1: i32, %arg2: i32, %arg3: memref<16x32xf32, #tpu.memory_space<vmem>>, %arg4: memref<32x96xf32, #tpu.memory_space<vmem>>, %arg5: memref<1x96xf32, #tpu.memory_space<vmem>>, %arg6: memref<16x96xbf16, #tpu.memory_space<vmem>>, %arg7: memref<16x96xf32, #tpu.memory_space<vmem>>) attributes {dimension_semantics = [#tpu.dimension_semantics<parallel>, #tpu.dimension_semantics<parallel>, #tpu.dimension_semantics<arbitrary>], iteration_bounds = array<i64: 1, 1, 1>, scalar_prefetch = 0 : i64, scratch_operands = 1 : i64, tpu.core_type = #tpu.core_type<tc>, window_params = [{transform_indices = @transform_0, window_bounds = array<i64: 16, 32>}, {transform_indices = @transform_1, window_bounds = array<i64: 32, 96>}, {transform_indices = @transform_2, window_bounds = array<i64: 1, 96>}, {transform_indices = @transform_3, window_bounds = array<i64: 16, 96>}]} {
    %c0_i32 = arith.constant 0 : i32
    %0 = arith.cmpi eq, %arg2, %c0_i32 : i32
    %1 = arith.extui %0 : i1 to i32
    %c0_i32_0 = arith.constant 0 : i32
    %2 = arith.cmpi ne, %1, %c0_i32_0 : i32
    scf.if %2 {
      %cst_10 = arith.constant 0.000000e+00 : f32
      %14 = vector.broadcast %cst_10 : f32 to vector<16x96xf32>
      %c0_11 = arith.constant 0 : index
      %c0_12 = arith.constant 0 : index
      %15 = vector.load %arg7[%c0_11, %c0_12] : memref<16x96xf32, #tpu.memory_space<vmem>>, vector<16x96xf32>
      tpu.vector_store %arg7[%c0_11, %c0_12], %14 {strides = array<i32>} : memref<16x96xf32, #tpu.memory_space<vmem>>, vector<16x96xf32>,
    } else {
    }
    %c0 = arith.constant 0 : index
    %c0_1 = arith.constant 0 : index
    %3 = vector.load %arg7[%c0, %c0_1] : memref<16x96xf32, #tpu.memory_space<vmem>>, vector<16x96xf32>
    %c0_2 = arith.constant 0 : index
    %c0_3 = arith.constant 0 : index
    %4 = vector.load %arg3[%c0_2, %c0_3] : memref<16x32xf32, #tpu.memory_space<vmem>>, vector<16x32xf32>
    %5 = arith.truncf %4 : vector<16x32xf32> to vector<16x32xbf16>
    %c0_4 = arith.constant 0 : index
    %c0_5 = arith.constant 0 : index
    %6 = vector.load %arg4[%c0_4, %c0_5] : memref<32x96xf32, #tpu.memory_space<vmem>>, vector<32x96xf32>
    %7 = arith.truncf %6 : vector<32x96xf32> to vector<32x96xbf16>
    %cst = arith.constant dense<0.000000e+00> : vector<16x96xf32>
    %8 = tpu.matmul %5, %7, %cst {dimension_numbers = #tpu.dot_dimension_numbers<[1], [0], [0], [1], [0, 0, 1, 1], [], []>} : vector<16x32xbf16>, vector<32x96xbf16>, vector<16x96xf32> -> vector<16x96xf32>
    %9 = arith.addf %3, %8 : vector<16x96xf32>
    %c0_6 = arith.constant 0 : index
    %c0_7 = arith.constant 0 : index
    %10 = vector.load %arg7[%c0_6, %c0_7] : memref<16x96xf32, #tpu.memory_space<vmem>>, vector<16x96xf32>
    tpu.vector_store %arg7[%c0_6, %c0_7], %9 {strides = array<i32>} : memref<16x96xf32, #tpu.memory_space<vmem>>, vector<16x96xf32>,
    %c0_i32_8 = arith.constant 0 : i32
    %11 = arith.cmpi eq, %arg2, %c0_i32_8 : i32
    %12 = arith.extui %11 : i1 to i32
    %c0_i32_9 = arith.constant 0 : i32
    %13 = arith.cmpi ne, %12, %c0_i32_9 : i32
    scf.if %13 {
      %c0_10 = arith.constant 0 : index
      %c0_11 = arith.constant 0 : index
      %14 = vector.load %arg7[%c0_10, %c0_11] : memref<16x96xf32, #tpu.memory_space<vmem>>, vector<16x96xf32>
      %c0_12 = arith.constant 0 : index
      %c0_13 = arith.constant 0 : index
      %15 = vector.load %arg5[%c0_12, %c0_13] : memref<1x96xf32, #tpu.memory_space<vmem>>, vector<1x96xf32>
      %16 = vector.broadcast %15 : vector<1x96xf32> to vector<16x96xf32>
      %17 = arith.addf %14, %16 : vector<16x96xf32>
      %18 = arith.truncf %17 : vector<16x96xf32> to vector<16x96xbf16>
      %c0_14 = arith.constant 0 : index
      %c0_15 = arith.constant 0 : index
      %19 = vector.load %arg6[%c0_14, %c0_15] : memref<16x96xbf16, #tpu.memory_space<vmem>>, vector<16x96xbf16>
      tpu.vector_store %arg6[%c0_14, %c0_15], %18 {strides = array<i32>} : memref<16x96xbf16, #tpu.memory_space<vmem>>, vector<16x96xbf16>,
    } else {
    }
    return
  }
  func.func @transform_0(%arg0: i32, %arg1: i32, %arg2: i32) -> (i32, i32) {
    %c0_i32 = arith.constant 0 : i32
    return %arg0, %arg2 : i32, i32
  }
  func.func @transform_1(%arg0: i32, %arg1: i32, %arg2: i32) -> (i32, i32) {
    %c0_i32 = arith.constant 0 : i32
    return %arg2, %arg1 : i32, i32
  }
  func.func @transform_2(%arg0: i32, %arg1: i32, %arg2: i32) -> (i32, i32) {
    %c0_i32 = arith.constant 0 : i32
    %c0_i32_0 = arith.constant 0 : i32
    return %c0_i32, %arg1 : i32, i32
  }
  func.func @transform_3(%arg0: i32, %arg1: i32, %arg2: i32) -> (i32, i32) {
    %c0_i32 = arith.constant 0 : i32
    return %arg0, %arg1 : i32, i32
  }
}

</mosaic_0001>

<bundles_post_ra>
// kernel: tpu_custom_call.1
= control target key start
LH: loop header
LB: loop body
LE: loop exit
PB: predicated region body
PF: predicated region fallthrough
CT: control target
= control target key end

     0   :  { %8 = vsyncpa [#allocation4], 0  ;;  %s325_s0 = inlined_call_operand.hbm [shape: f32[16,32], index: 0, kind: input, shape index: {}]   ;;  %s326_s1 = inlined_call_operand.hbm [shape: f32[32,96], index: 1, kind: input, shape index: {}]   ;;  %s327_s2 = inlined_call_operand.vmem [shape: f32[1,96], index: 2, kind: input, shape index: {}]   ;;  %s328_s3 = inlined_call_operand.hbm [shape: bf16[16,96], index: 3, kind: output, shape index: {}]  }
   0x1   :  { %9 = vsyncpa [#allocation7], 0 }
   0x2   :  { %10 = vsyncpa [#allocation5], 0  ;;  %s253_s12 = smov [#allocation3]   ;;  %s181_s16 = scalar_lea.hbm %s325_s0, 256 }
   0x3   :  { %s16_s13 = sshll.u32 %s253_s12, 4  ;;  %p182_p0 = scmp.ne.s32.totalorder %s325_s0, %s181_s16  ;;  %s17_s13 = int_to_ptr.vmem [resolvable:$true] %s16_s13 }
   0x4   :  { %p185_p1 = scmp.lt.u32.totalorder %s181_s16, %s325_s0 }
   0x6   :  { %p187_p2 = pnand %p185_p1, %p182_p0 }
   0x8   :  { %190 = shalt.err (!%p187_p2)
}
   0x9   :  { %s191_s21 = scalar_lea.vmem %s17_s13, 256  ;;  %p196_p4 = scmp.lt.s32.totalorder %s17_s13, %s17_s13 }
   0xa   :  { %p192_p3 = scmp.ne.s32.totalorder %s17_s13, %s191_s21  ;;  %p197_p5 = scmp.lt.s32.totalorder %s191_s21, %s191_s21 }
   0xc   :  { %p198_p6 = por %p197_p5, %p196_p4 }
   0xe   :  { %p199_p7 = pnand %p198_p6, %p192_p3 }
  0x10   :  { %202 = shalt.err (!%p199_p7)
}
  0x11   :  { %s254_s22 = smov 128   ;;  %s255_s23 = smov 8  }
  0x12   :  { %22 = dma.hbm_to_vmem [thread:$0]  %s325_s0, 256, %s17_s13, [#allocation4], %s254_s22, %s254_s22, %s255_s23  }
  0x13   :  { %s256_s26 = smov [#allocation6]   ;;  %s203_s30 = scalar_lea.hbm %s326_s1, 512 }
  0x14   :  { %s28_s27 = sshll.u32 %s256_s26, 4  ;;  %p204_p8 = scmp.ne.s32.totalorder %s326_s1, %s203_s30  ;;  %s29_s27 = int_to_ptr.vmem [resolvable:$true] %s28_s27 }
  0x15   :  { %p207_p9 = scmp.lt.u32.totalorder %s203_s30, %s326_s1 }
  0x17   :  { %p209_p10 = pnand %p207_p9, %p204_p8 }
  0x19   :  { %212 = shalt.err (!%p209_p10)
}
  0x1a   :  { %s213_s8 = scalar_lea.vmem %s29_s27, 512  ;;  %p218_p12 = scmp.lt.s32.totalorder %s29_s27, %s29_s27 }
  0x1b   :  { %p214_p11 = scmp.ne.s32.totalorder %s29_s27, %s213_s8  ;;  %p219_p13 = scmp.lt.s32.totalorder %s213_s8, %s213_s8 }
  0x1d   :  { %p220_p0 = por %p219_p13, %p218_p12 }
  0x1f   :  { %p221_p1 = pnand %p220_p0, %p214_p11 }
  0x21   :  { %224 = shalt.err (!%p221_p1)
}
  0x22   :  { %34 = dma.hbm_to_vmem [thread:$0]  %s326_s1, 512, %s29_s27, [#allocation7], %s254_s22, %s254_s22, %s255_s23  }
  0x23   :  { %247 = dma.done.wait [#allocation4], 256  }
  0x24   :  { %248 = vsyncadd [#allocation4], 4294967040 }
  0x25   :  { %249 = dma.done.wait [#allocation7], 512  }
  0x26   :  { %250 = vsyncadd [#allocation7], 4294966784  ;;  %vm48_vm0 = vcmask 785408   ;;  %v257_v0 = vmov 0.0   ;;  %vm258_vm1 = vmmov 0   ;;  %v56_v1 = vld [vmem:[#allocation6] sm:$0xff] }
  0x27   :  { %49 = vst.msk [vmem:[#allocation2] sm:$0xff] %vm48_vm0, %v257_v0  ;;  %50 = vst.msk [vmem:[#allocation2 + $0x8] sm:$0xff] %vm48_vm0, %v257_v0  ;;  %164 = vmatprep.subr.bf16.mxu0 %v257_v0  ;;  %168 = vmatprep.mubr.msk.bf16.mxu0 %vm258_vm1, %v257_v0  ;;  %v57_v2 = vld [vmem:[#allocation6 + $0x8] sm:$0xff]  ;;  %v58_v3 = vld [vmem:[#allocation6 + $0x10] sm:$0xff]  ;;  %vm62_vm2 = vcmask 261120   ;;  %s259_s11 = smov [#allocation8]  }
  0x28   :  { %v60_v4 = vpack.c.bf16 %v57_v2, %v56_v1  ;;  %v59_v5 = vld [vmem:[#allocation6 + $0x18] sm:$0xff]  ;;  %v53_v7 = vld [vmem:[#allocation3] sm:$0xff]  ;;  %v156_v18 = vld [vmem:[%s327_s2] ss:$0 sm:$0xff]  ;;  %s142_s12 = sshll.u32 %s259_s11, 4  ;;  %vm134_vm3 = vcmask 781312   ;;  %s143_s12 = int_to_ptr.vmem [resolvable:$true] %s142_s12 }
  0x29   :  { %v61_v6 = vpack.c.bf16 %v59_v5, %v58_v3  ;;  %v54_v8 = vld [vmem:[#allocation3 + $0x8] sm:$0xff]  ;;  %s225_s13 = scalar_lea.vmem %s143_s12, 128  ;;  %p230_p3 = scmp.lt.s32.totalorder %s143_s12, %s143_s12 }
  0x2a   :  { %165 = vmatpush3.bf16.msra.mxu0 %v60_v4  ;;  %v55_v9 = vpack.c.bf16 %v54_v8, %v53_v7  ;;  %p226_p2 = scmp.ne.s32.totalorder %s143_s12, %s225_s13  ;;  %p231_p4 = scmp.lt.s32.totalorder %s225_s13, %s225_s13 }
  0x2b   :  { %166 = vmatprep.subr.bf16.mxu0 %v257_v0 }
  0x2c   :  { %p232_p5 = por %p231_p4, %p230_p3 }
  0x2e   :  { %167 = vmatpush3.bf16.msra.mxu0 %v61_v6  ;;  %v51_v10 = vld [vmem:[#allocation2] sm:$0xff]  ;;  %v52_v12 = vld [vmem:[#allocation2 + $0x8] sm:$0xff]  ;;  %p233_p6 = pnand %p232_p5, %p226_p2 }
  0x31   :  { %169 = vmatmul.mubr.msk.bf16.vlgmr.msra.gmra.mrb[0].mxu0 %vm62_vm2, %v55_v9 }
 0x104   :  { %v100_v11 = vpop.f32.mrb[0].mxu0 }
 0x105   :  { %v107_v13 = vadd.f32 %v100_v11, %v51_v10  ;;  %v170_v14 = vpop.f32.mrb[1].mxu0 }
 0x106   :  { %v103_v15 = vpop.f32.mrb[2].mxu0 }
 0x107   :  { %110 = vst.msk [vmem:[#allocation2] sm:$0xff] %vm48_vm0, %v107_v13  ;;  %v108_v16 = vadd.f32 %v103_v15, %v52_v12  ;;  %v171_v17 = vpop.f32.mrb[3].mxu0 }
 0x109   :  { %111 = vst.msk [vmem:[#allocation2 + $0x8] sm:$0xff] %vm48_vm0, %v108_v16 }
 0x10e   :  { %v115_v19 = vld [vmem:[#allocation2] sm:$0xff] }
 0x10f   :  { %v124_v20 = vadd.f32 %v156_v18, %v115_v19 }
 0x110   :  { %v116_v21 = vld [vmem:[#allocation2 + $0x8] sm:$0xff] }
 0x111   :  { %v125_v22 = vadd.f32 %v156_v18, %v116_v21  ;;  %v159_v23 = vpack.c.bf16 %v124_v20, %v124_v20 }
 0x113   :  { %v160_v24 = vpack.c.bf16 %v125_v22, %v125_v22  ;;  %135 = vst.msk [vmem:[#allocation8] sm:$0xf] %vm134_vm3, %v159_v23 }
 0x115   :  { %136 = vst.msk [vmem:[#allocation8 + $0x4] sm:$0xf] %vm134_vm3, %v160_v24 }
 0x116   :  { %236 = shalt.err (!%p233_p6)
}
 0x117   :  { %s237_s15 = scalar_lea.hbm %s328_s3, 128 }
 0x118   :  { %p238_p7 = scmp.ne.s32.totalorder %s328_s3, %s237_s15  ;;  %p241_p8 = scmp.lt.u32.totalorder %s237_s15, %s328_s3 }
 0x11a   :  { %p243_p9 = pnand %p241_p8, %p238_p7 }
 0x11c   :  { %246 = shalt.err (!%p243_p9)
}
 0x11d   :  { %s260_s20 = smov 64   ;;  %s261_s21 = smov 4  }
 0x11e   :  { %148 = dma.vmem_to_hbm [thread:$0]  %s143_s12, 128, %s328_s3, [#allocation5], %s260_s20, %s260_s20, %s261_s21  }
 0x11f   :  { %251 = dma.done.wait [#allocation5], 128  }
 0x120   :  { %252 = vsyncadd [#allocation5], 4294967168 }
 0x121   :  { %152 = vsyncpa [#allocation4], 1 }
 0x122   :  { %153 = vsyncpa [#allocation7], 1 }
 0x123   :  { %154 = vsyncpa [#allocation5], 1 }

</bundles_post_ra>
